<compile_context>
chip_gen: v6e
topology: v6e:2x2x1
jax: 0.10.0
libtpu: 0.0.40
codegen_flags: <defaults>
</compile_context>

<pallas_src>
import functools

import jax
import jax.numpy as jnp
from jax.experimental import pallas as pl
from jax.experimental.pallas import tpu as pltpu


def _decoder_norm_kernel(params_ref, x_ref, o_ref, *, eps, d_true):
    """alpha * (x - mean) / (std + eps) + bias per row; std unbiased (ddof=1)."""
    # params_ref: SMEM f32[2] = [alpha, bias]
    # x_ref/o_ref: VMEM tile [rows_per_tile, d_true] (last dim == full array dim)
    x = x_ref[...].astype(jnp.float32)

    alpha = params_ref[0]
    bias = params_ref[1]

    # Single pass: sum and sum-of-squares. Block last dim equals the true feature
    # dim, so Mosaic masks the partial-lane tail and the reductions are exact.
    s1 = jnp.sum(x, axis=-1, keepdims=True)
    s2 = jnp.sum(x * x, axis=-1, keepdims=True)
    mean = s1 * jnp.float32(1.0 / d_true)

    # torch.Tensor.std defaults to the unbiased estimator (ddof = 1).
    # d_model >= 2 assumed (torch itself returns NaN for d_model == 1).
    var = jnp.maximum(s2 - s1 * mean, jnp.float32(0.0)) * jnp.float32(
        1.0 / max(d_true - 1, 1)
    )
    std = jnp.sqrt(var)

    # Per-row fused scale: one full-width mul + add instead of mul + div.
    # Exact reciprocal kept so results stay within 1e-5 of the reference.
    scale = alpha * pl.reciprocal(std + jnp.float32(eps), approx=False)
    o_ref[...] = ((x - mean) * scale + bias).astype(o_ref.dtype)


def _round_up(n, m):
    return ((n + m - 1) // m) * m


def _vmem_capacity_bytes():
    """Chip-aware VMEM capacity; conservative 64 MiB (v7x per-TC) fallback."""
    try:
        info = pltpu.get_tpu_info()
        cap = getattr(info, "vmem_capacity_bytes", None)
        if cap:
            return int(cap)
    except Exception:
        pass
    return 64 << 20


def _choose_rows_per_tile(rows, d, itemsize, tile_budget_bytes):
    """Largest sublane-aligned row tile that fits the VMEM budget.

    Budget model per row: input + output blocks, each double-buffered
    (4 * itemsize * d), plus ~2 f32 full-tile temporaries (8 * d bytes) for the
    single-pass normalize.
    """
    sublane = {4: 8, 2: 16, 1: 32}.get(itemsize, 8)
    per_row_bytes = d * (4 * itemsize + 8)
    rpt = tile_budget_bytes // per_row_bytes
    # Cap the input block at ~8 MiB (beyond that per-step overhead is already <<1%).
    rpt = min(rpt, (8 << 20) // (d * itemsize))
    rpt = max(sublane, (rpt // sublane) * sublane)
    # Don't pad tiny inputs out to a huge tile.
    rpt = min(rpt, _round_up(rows, sublane))
    # Megacore balance (v7x, 2 TCs): when multi-block, aim for >= 8 grid steps so
    # the "parallel" row axis splits ~evenly; tiles stay multi-MiB so overhead is low.
    if rows > rpt and pl.cdiv(rows, rpt) < 8:
        rpt = max(sublane, _round_up(pl.cdiv(rows, 8), sublane))
    return rpt


def layer_norm_pallas(x, alpha, bias, eps=1e-6, rows_per_tile=None):
    """LayerNormalization over the last axis (scalar alpha/bias, unbiased std)."""
    orig_shape = x.shape
    d = orig_shape[-1]
    x2 = x.reshape(-1, d)          # collapse of leading dims: no HBM copy
    rows = x2.shape[0]

    itemsize = jnp.dtype(x.dtype).itemsize
    vmem_cap = _vmem_capacity_bytes()
    tile_budget = max(8 << 20, min(int(vmem_cap * 0.28), 36 << 20))
    vmem_limit = max(32 << 20, min(int(vmem_cap * 0.70), 80 << 20))

    if rows_per_tile is None:
        rows_per_tile = _choose_rows_per_tile(rows, d, itemsize, tile_budget)

    params = jnp.stack(
        [jnp.asarray(alpha, jnp.float32).reshape(()),
         jnp.asarray(bias, jnp.float32).reshape(())]
    )

    kernel = functools.partial(_decoder_norm_kernel, eps=eps, d_true=d)
    out = pl.pallas_call(
        kernel,
        out_shape=jax.ShapeDtypeStruct((rows, d), x.dtype),
        grid=(pl.cdiv(rows, rows_per_tile),),
        in_specs=[
            pl.BlockSpec(memory_space=pltpu.MemorySpace.SMEM),        # [alpha, bias]
            pl.BlockSpec((rows_per_tile, d), lambda i: (i, 0)),       # x tile
        ],
        out_specs=pl.BlockSpec((rows_per_tile, d), lambda i: (i, 0)),
        compiler_params=pltpu.CompilerParams(
            dimension_semantics=("parallel",),
            vmem_limit_bytes=vmem_limit,
        ),
    )(params, x2)

    return out.reshape(orig_shape)


def decoder_forward(x, encoder_output, src_mask, tgt_mask, layers, alpha, bias,
                    eps=1e-6):
    """Decoder.forward: run each layer, then the final LayerNormalization."""
    for layer in layers:
        x = layer(x, encoder_output, src_mask, tgt_mask)
    return layer_norm_pallas(x, alpha, bias, eps)


def _reference_norm(x, alpha, bias, eps=1e-6):
    xf = x.astype(jnp.float32)
    mean = jnp.mean(xf, axis=-1, keepdims=True)
    std = jnp.std(xf, axis=-1, keepdims=True, ddof=1)
    return (alpha * (xf - mean) / (std + eps) + bias).astype(x.dtype)


if __name__ == "__main__":
    key = jax.random.PRNGKey(0)
    k1, k2, k3 = jax.random.split(key, 3)

    # Deterministic parameters matching LayerNormalization.__init__:
    # alpha = ones(1), bias = zeros(1).
    alpha = jnp.ones((), dtype=jnp.float32)
    bias = jnp.zeros((), dtype=jnp.float32)
    layers = []  # no DecoderBlock definition provided in the reference module

    # --- primary check: small transformer-ish shapes ---
    batch, seq, d_model = 2, 8, 32
    x = jax.random.normal(k1, (batch, seq, d_model), dtype=jnp.float32)
    encoder_output = jax.random.normal(k2, (batch, seq, d_model), dtype=jnp.float32)
    src_mask = jnp.ones((batch, 1, 1, seq), dtype=jnp.float32)
    tgt_mask = jnp.tril(jnp.ones((seq, seq), dtype=jnp.float32))[None, None]

    out = decoder_forward(x, encoder_output, src_mask, tgt_mask, layers, alpha, bias)
    out = jax.block_until_ready(out)
    ref = _reference_norm(x, alpha, bias)
    assert out.shape == x.shape
    assert jnp.allclose(out, ref, atol=1e-5, rtol=1e-5), "mismatch vs reference"

    # --- ragged / multi-block check: rows not a multiple of the tile, forcing
    #     a multi-step grid and a partial last block (OOB writes dropped). ---
    x2 = jax.random.normal(k3, (4, 9, 48), dtype=jnp.float32)   # rows = 36
    out2 = layer_norm_pallas(x2, alpha, bias, rows_per_tile=8)  # 5 grid steps
    out2 = jax.block_until_ready(out2)
    ref2 = _reference_norm(x2, alpha, bias)
    assert out2.shape == x2.shape
    assert jnp.allclose(out2, ref2, atol=1e-5, rtol=1e-5), "ragged mismatch"

    print("KERNEL_OK")
</pallas_src>

<mosaic_0001>
module attributes {stable_mosaic.version = 11 : i64} {
  func.func @_decoder_norm_kernel(%arg0: i32, %arg1: memref<2xf32, #tpu.memory_space<smem>>, %arg2: memref<16x32xf32, #tpu.memory_space<vmem>>, %arg3: memref<16x32xf32, #tpu.memory_space<vmem>>) attributes {dimension_semantics = [#tpu.dimension_semantics<parallel>], iteration_bounds = array<i64: 1>, scalar_prefetch = 0 : i64, scratch_operands = 0 : i64, tpu.core_type = #tpu.core_type<tc>, window_params = [{transform_indices = @transform_0, window_bounds = array<i64: 2>}, {transform_indices = @transform_1, window_bounds = array<i64: 16, 32>}, {transform_indices = @transform_2, window_bounds = array<i64: 16, 32>}]} {
    %c0 = arith.constant 0 : index
    %c0_0 = arith.constant 0 : index
    %0 = vector.load %arg2[%c0, %c0_0] : memref<16x32xf32, #tpu.memory_space<vmem>>, vector<16x32xf32>
    %c0_1 = arith.constant 0 : index
    %1 = memref.load %arg1[%c0_1] : memref<2xf32, #tpu.memory_space<smem>>
    %c1 = arith.constant 1 : index
    %2 = memref.load %arg1[%c1] : memref<2xf32, #tpu.memory_space<smem>>
    %cst = arith.constant dense<0.000000e+00> : vector<16xf32>
    %3 = vector.multi_reduction <add>, %0, %cst [1] : vector<16x32xf32> to vector<16xf32>
    %4 = vector.shape_cast %3 : vector<16xf32> to vector<16x1xf32>
    %5 = arith.mulf %0, %0 : vector<16x32xf32>
    %cst_2 = arith.constant dense<0.000000e+00> : vector<16xf32>
    %6 = vector.multi_reduction <add>, %5, %cst_2 [1] : vector<16x32xf32> to vector<16xf32>
    %7 = vector.shape_cast %6 : vector<16xf32> to vector<16x1xf32>
    %cst_3 = arith.constant 3.125000e-02 : f32
    %8 = vector.broadcast %cst_3 : f32 to vector<16x1xf32>
    %9 = arith.mulf %4, %8 : vector<16x1xf32>
    %10 = arith.mulf %4, %9 : vector<16x1xf32>
    %11 = arith.subf %7, %10 : vector<16x1xf32>
    %cst_4 = arith.constant 0.000000e+00 : f32
    %12 = vector.broadcast %cst_4 : f32 to vector<16x1xf32>
    %13 = arith.maximumf %11, %12 : vector<16x1xf32>
    %cst_5 = arith.constant 0.0322580636 : f32
    %14 = vector.broadcast %cst_5 : f32 to vector<16x1xf32>
    %15 = arith.mulf %13, %14 : vector<16x1xf32>
    %16 = math.sqrt %15 : vector<16x1xf32>
    %cst_6 = arith.constant 9.99999997E-7 : f32
    %17 = vector.broadcast %cst_6 : f32 to vector<16x1xf32>
    %18 = arith.addf %16, %17 : vector<16x1xf32>
    %19 = tpu.reciprocal %18 : vector<16x1xf32> -> vector<16x1xf32>
    %20 = vector.broadcast %1 : f32 to vector<16x1xf32>
    %21 = arith.mulf %20, %19 : vector<16x1xf32>
    %22 = vector.broadcast %9 : vector<16x1xf32> to vector<16x32xf32>
    %23 = arith.subf %0, %22 : vector<16x32xf32>
    %24 = vector.broadcast %21 : vector<16x1xf32> to vector<16x32xf32>
    %25 = arith.mulf %23, %24 : vector<16x32xf32>
    %26 = vector.broadcast %2 : f32 to vector<16x32xf32>
    %27 = arith.addf %25, %26 : vector<16x32xf32>
    %c0_7 = arith.constant 0 : index
    %c0_8 = arith.constant 0 : index
    %28 = vector.load %arg3[%c0_7, %c0_8] : memref<16x32xf32, #tpu.memory_space<vmem>>, vector<16x32xf32>
    tpu.vector_store %arg3[%c0_7, %c0_8], %27 {strides = array<i32>} : memref<16x32xf32, #tpu.memory_space<vmem>>, vector<16x32xf32>,
    return
  }
  func.func @transform_0(%arg0: i32) -> i32 {
    %c0_i32 = arith.constant 0 : i32
    %c0_i32_0 = arith.constant 0 : i32
    return %c0_i32 : i32
  }
  func.func @transform_1(%arg0: i32) -> (i32, i32) {
    %c0_i32 = arith.constant 0 : i32
    %c0_i32_0 = arith.constant 0 : i32
    return %arg0, %c0_i32 : i32, i32
  }
  func.func @transform_2(%arg0: i32) -> (i32, i32) {
    %c0_i32 = arith.constant 0 : i32
    %c0_i32_0 = arith.constant 0 : i32
    return %arg0, %c0_i32 : i32, i32
  }
}

</mosaic_0001>

<bundles_post_ra>
// kernel: tpu_custom_call.1
= control target key start
LH: loop header
LB: loop body
LE: loop exit
PB: predicated region body
PF: predicated region fallthrough
CT: control target
= control target key end

     0   :  { %7 = vsyncpa [#allocation5], 0  ;;  %s223_s0 = inlined_call_operand.hbm [shape: f32[2], index: 0, kind: input, shape index: {}]   ;;  %s224_s1 = inlined_call_operand.hbm [shape: f32[16,32], index: 1, kind: input, shape index: {}]   ;;  %s225_s2 = inlined_call_operand.hbm [shape: f32[16,32], index: 2, kind: output, shape index: {}]  }
   0x1   :  { %8 = vsyncpa [#allocation3], 0 }
   0x2   :  { %9 = vsyncpa [#allocation4], 0  ;;  %s182_s9 = smov [#allocation2]   ;;  %s183_s12 = smov [#allocation6]  }
   0x3   :  { %17 = dma.hbm_to_smem %s223_s0, 16, %s182_s9, [#allocation5]  }
   0x4   :  { %s23_s13 = sshll.u32 %s183_s12, 4  ;;  %s24_s13 = int_to_ptr.vmem [resolvable:$true] %s23_s13 }
   0x5   :  { %s144_s14 = scalar_lea.vmem %s24_s13, 256  ;;  %p149_p1 = scmp.lt.s32.totalorder %s24_s13, %s24_s13 }
   0x6   :  { %p145_p0 = scmp.ne.s32.totalorder %s24_s13, %s144_s14  ;;  %p150_p2 = scmp.lt.s32.totalorder %s144_s14, %s144_s14 }
   0x8   :  { %p151_p3 = por %p150_p2, %p149_p1 }
   0xa   :  { %p152_p4 = pnand %p151_p3, %p145_p0 }
   0xc   :  { %155 = shalt.err (!%p152_p4)
}
   0xd   :  { %s184_s15 = smov 128   ;;  %s185_s16 = smov 8  }
   0xe   :  { %29 = dma.hbm_to_vmem [thread:$0]  %s224_s1, 256, %s24_s13, [#allocation3], %s184_s15, %s184_s15, %s185_s16  }
   0xf   :  { %176 = dma.done.wait [#allocation5], 16  }
  0x10   :  { %177 = vsyncadd [#allocation5], 4294967280 }
  0x11   :  { %178 = dma.done.wait [#allocation3], 256  }
  0x12   :  { %179 = vsyncadd [#allocation3], 4294967040 }
  0x13   :  { %36 = sfence }
  0x14   :  { %v37_v0 = vld [vmem:[#allocation6] sm:$0xff]  ;;  %vm41_vm0 = vcmask 261120   ;;  %v38_v1 = vld [vmem:[#allocation6 + $0x8] sm:$0xff]  ;;  %s39_s0 = sld [smem:[#allocation2]]  ;;  %s186_s19 = smov [#allocation7]  }
  0x15   :  { %v42_v2 = vsel %vm41_vm0, %v37_v0, 0.0  ;;  %v48_v3 = vmul.f32 %v37_v0, %v37_v0  ;;  %v49_v4 = vmul.f32 %v38_v1, %v38_v1  ;;  %v45_v6 = vsel %vm41_vm0, %v38_v1, 0.0  ;;  %s114_s1 = sld [smem:[#allocation2 + $0x1]]  ;;  %s101_s20 = sshll.u32 %s186_s19, 4  ;;  %s102_s20 = int_to_ptr.vmem [resolvable:$true] %s101_s20 }
  0x16   :  { %43 = vadd.xlane.f32.xlu0 %v42_v2  ;;  %s156_s21 = scalar_lea.vmem %s102_s20, 256  ;;  %p161_p6 = scmp.lt.s32.totalorder %s102_s20, %s102_s20 }
  0x17   :  { %v50_v5 = vsel %vm41_vm0, %v48_v3, 0.0  ;;  %v53_v7 = vsel %vm41_vm0, %v49_v4, 0.0  ;;  %p157_p5 = scmp.ne.s32.totalorder %s102_s20, %s156_s21  ;;  %p162_p7 = scmp.lt.s32.totalorder %s156_s21, %s156_s21 }
  0x18   :  { %51 = vadd.xlane.f32.xlu1 %v50_v5 }
  0x19   :  { %p163_p8 = por %p162_p7, %p161_p6 }
  0x1a   :  { %46 = vadd.xlane.f32.xlu0 %v45_v6  ;;  %v84_v34 = vstv %s39_s0 }
  0x1b   :  { %v91_v38 = vstv %s114_s1  ;;  %p164_p9 = pnand %p163_p8, %p157_p5 }
  0x1c   :  { %54 = vadd.xlane.f32.xlu1 %v53_v7 }
  0x9f   :  { %v44_v8 = vpop.xlane.xlu0 %43 }
  0xa0   :  { %v56_v9 = vmul.f32 0.03125, %v44_v8 }
  0xa1   :  { %v52_v10 = vpop.xlane.xlu1 %51 }
  0xa2   :  { %v58_v11 = vmul.f32 %v56_v9, %v44_v8  ;;  %v87_v36 = vsub.f32 %v37_v0, %v56_v9 }
  0xa3   :  { %v47_v12 = vpop.xlane.xlu0 %46 }
  0xa4   :  { %v60_v13 = vsub.f32 %v52_v10, %v58_v11  ;;  %v57_v14 = vmul.f32 0.03125, %v47_v12 }
  0xa5   :  { %v55_v15 = vpop.xlane.xlu1 %54 }
  0xa6   :  { %v62_v16 = vmax.f32 %v60_v13, 0.0  ;;  %v59_v17 = vmul.f32 %v57_v14, %v47_v12  ;;  %v88_v42 = vsub.f32 %v38_v1, %v57_v14 }
  0xa8   :  { %v64_v18 = vmul.f32 0.032258064, %v62_v16  ;;  %v61_v19 = vsub.f32 %v55_v15, %v59_v17 }
  0xaa   :  { %120 = vrsqrt.f32 %v64_v18  ;;  %v63_v20 = vmax.f32 %v61_v19, 0.0  ;;  %vm68_vm1 = vcmp.eq.f32.partialorder %v64_v18, inf  ;;  %v71_v24 = vand.u32 2147483648, %v64_v18 }
  0xab   :  { %vm70_vm2 = vcmp.eq.f32.partialorder %v64_v18, 0.0 }
  0xac   :  { %v65_v21 = vmul.f32 0.032258064, %v63_v20 }
  0xae   :  { %122 = vrsqrt.f32 %v65_v21  ;;  %vm75_vm3 = vcmp.eq.f32.partialorder %v65_v21, inf  ;;  %v78_v30 = vand.u32 2147483648, %v65_v21  ;;  %vm77_vm4 = vcmp.eq.f32.partialorder %v65_v21, 0.0 }
  0xb7   :  { %v121_v22 = vpop.eup %120 }
  0xb8   :  { %v67_v23 = vmul.f32 %v121_v22, %v64_v18 }
  0xba   :  { %v69_v25 = vsel %vm68_vm1, %v64_v18, %v67_v23 }
  0xbb   :  { %v72_v26 = vsel %vm70_vm2, %v71_v24, %v69_v25  ;;  %v123_v27 = vpop.eup %122 }
  0xbc   :  { %v80_v28 = vadd.f32 1e-06, %v72_v26  ;;  %v74_v29 = vmul.f32 %v123_v27, %v65_v21 }
  0xbe   :  { %124 = vrcp.f32 %v80_v28  ;;  %v76_v31 = vsel %vm75_vm3, %v65_v21, %v74_v29 }
  0xbf   :  { %v79_v32 = vsel %vm77_vm4, %v78_v30, %v76_v31 }
  0xc0   :  { %v81_v33 = vadd.f32 1e-06, %v79_v32 }
  0xc2   :  { %126 = vrcp.f32 %v81_v33 }
  0xcb   :  { %v125_v35 = vpop.eup %124 }
  0xcc   :  { %v85_v37 = vmul.f32 %v125_v35, %v84_v34 }
  0xce   :  { %v89_v39 = vmul.f32 %v87_v36, %v85_v37 }
  0xcf   :  { %v127_v40 = vpop.eup %126 }
  0xd0   :  { %v92_v41 = vadd.f32 %v91_v38, %v89_v39  ;;  %v86_v43 = vmul.f32 %v127_v40, %v84_v34 }
  0xd2   :  { %94 = vst.msk [vmem:[#allocation7] sm:$0xff] %vm41_vm0, %v92_v41  ;;  %v90_v44 = vmul.f32 %v88_v42, %v86_v43 }
  0xd4   :  { %v93_v45 = vadd.f32 %v91_v38, %v90_v44 }
  0xd6   :  { %95 = vst.msk [vmem:[#allocation7 + $0x8] sm:$0xff] %vm41_vm0, %v93_v45 }
  0xd7   :  { %167 = shalt.err (!%p164_p9)
}
  0xd8   :  { %107 = dma.vmem_to_hbm [thread:$0]  %s102_s20, 256, %s225_s2, [#allocation4], %s184_s15, %s184_s15, %s185_s16  }
  0xd9   :  { %180 = dma.done.wait [#allocation4], 256  }
  0xda   :  { %181 = vsyncadd [#allocation4], 4294967040 }
  0xdb   :  { %111 = vsyncpa [#allocation3], 1 }
  0xdc   :  { %112 = vsyncpa [#allocation4], 1 }
  0xdd   :  { %113 = vsyncpa [#allocation5], 1 }

</bundles_post_ra>
